<compile_context>
chip_gen: v7x
topology: tpu7x:2x2x1
jax: 0.10.0
libtpu: 0.0.40
codegen_flags: <defaults>
</compile_context>

<pallas_src>
import jax
import jax.numpy as jnp
from jax.experimental import pallas as pl
from jax.experimental.pallas import tpu as pltpu

HIDDEN = 32  # hidden_size == embedding dim (module requires E == H)


# ------------------------------- fused kernel --------------------------------

def _input_module_kernel(ctx_ref, emb_ref, pos_ref, fmask_ref,
                         wi_ref, bgi_ref, whbd_ref, bhn_ref,
                         out_ref, hb_sc):
    # ctx_ref:   (1, T*B_c*S, 1) int32 token ids, rows ordered (t, b_c, s)
    # emb_ref:   (V, E)           full embedding table, VMEM-resident
    # pos_ref:   (T, 1, E)        position-encoding weights
    # fmask_ref: (1, 6H)          1.0 on fwd gate columns, 0.0 on bwd columns
    # wi_ref:    (E, 6H)          merged input projections, gate-major
    #                             columns [r_f r_b | z_f z_b | n_f n_b]
    # bgi_ref:   (1, 6H)          folded biases (b_i+b_h for r,z ; b_in for n)
    # whbd_ref:  (2H, 6H)         block-diagonal fused recurrence weight
    # bhn_ref:   (1, 6H)          b_hn on the n columns only (inside r * (.))
    # out_ref:   (1, B_c, S*H)    lane-dense facts for this batch chunk
    # hb_sc:     (B_c, S*H)       VMEM scratch for the backward-direction states
    T = pos_ref.shape[0]
    H = pos_ref.shape[2]
    B_c = out_ref.shape[1]
    S = out_ref.shape[2] // H
    V = emb_ref.shape[0]
    BS = B_c * S

    # ---- embedding gather fused in-kernel: one-hot compare + one MXU matmul ----
    ids = ctx_ref[0]                                               # (T*BS, 1) int32
    iota_v = jax.lax.broadcasted_iota(jnp.int32, (T * BS, V), 1)
    onehot = (iota_v == ids).astype(jnp.float32)                   # (T*BS, V)
    gathered = jnp.dot(onehot, emb_ref[...],
                       preferred_element_type=jnp.float32)         # (T*BS, E)

    # ---- position encoding: accumulate over the token axis (contiguous blocks) ----
    # NOTE: pos table uses the reference's 0-based /(T-1), /(E-1) formula
    # (undefined for T==1 or E==1, exactly like the PyTorch module).
    x = gathered[0:BS] * pos_ref[0]                                # (BS, E)
    for t in range(1, T):
        x = x + gathered[t * BS:(t + 1) * BS] * pos_ref[t]
    # TODO(synk): nn.Dropout(0.1) is identity at inference; a prng-mask path
    # (pltpu.prng_random_bits) would be needed for training parity.

    # ---- hoisted input projections: one matmul for every step/gate/direction ----
    gi = jnp.dot(x, wi_ref[...], preferred_element_type=jnp.float32) + bgi_ref[...]
    gi3 = gi.reshape(B_c, S, 6 * H)                                # rows (b_c, s)

    fmask = fmask_ref[...] != 0.0                                  # (1, 6H) bool
    whbd = whbd_ref[...]                                           # (2H, 6H)
    bhn = bhn_ref[...]                                             # (1, 6H)

    # ---- bidirectional GRU: one block-diag MXU push per timestep ----
    # h = [h_f | h_b] (B_c, 2H); gate columns are direction-aligned so every
    # gate op is one contiguous (B_c, 2H/4H) vector stream.
    h = jnp.zeros((B_c, 2 * H), dtype=jnp.float32)
    for i in range(S):
        j = S - 1 - i
        # fwd columns read the x-projection at step i, bwd columns at step j.
        gi_t = jnp.where(fmask, gi3[:, i, :], gi3[:, j, :])        # (B_c, 6H)
        gh = jnp.dot(h, whbd, preferred_element_type=jnp.float32) + bhn
        rz = jax.nn.sigmoid(gi_t[:, 0:4 * H] + gh[:, 0:4 * H])     # [r_f r_b z_f z_b]
        r = rz[:, 0:2 * H]
        z = rz[:, 2 * H:4 * H]
        n = jnp.tanh(gi_t[:, 4 * H:6 * H] + r * gh[:, 4 * H:6 * H])
        h = (1.0 - z) * n + z * h
        # write per-step states straight into their lane slots (no concat/lists)
        out_ref[0, :, i * H:(i + 1) * H] = h[:, 0:H]               # fwd state @ step i
        hb_sc[:, j * H:(j + 1) * H] = h[:, H:2 * H]                # bwd state @ step j

    # facts = h_fwd + h_bwd : single full-lane-width combine + store
    out_ref[0] = out_ref[0] + hb_sc[...]


# ------------------------------ parameter setup -------------------------------

def init_gru_params(key, hidden):
    """Xavier-normal weights + PyTorch-default uniform biases (gate order r,z,n),
    converted to the kernel's merged gate-major / block-diagonal layouts with
    biases pre-folded."""
    H = hidden
    keys = jax.random.split(key, 8)

    def xavier(k, shape):  # shape = (fan_out, fan_in) in PyTorch convention
        fan_out, fan_in = shape
        std = (2.0 / (fan_in + fan_out)) ** 0.5
        return std * jax.random.normal(k, shape, dtype=jnp.float32)

    kb = 1.0 / (H ** 0.5)
    per_dir = []
    for off in (0, 4):  # forward, backward direction
        w_ih = xavier(keys[off + 0], (3 * H, H))   # PyTorch layout (3H, in), gates r,z,n
        w_hh = xavier(keys[off + 1], (3 * H, H))
        b_ih = jax.random.uniform(keys[off + 2], (3 * H,), jnp.float32, -kb, kb)
        b_hh = jax.random.uniform(keys[off + 3], (3 * H,), jnp.float32, -kb, kb)
        per_dir.append((w_ih, w_hh, b_ih, b_hh))

    (wif, whf, bif, bhf), (wib, whb, bib, bhb) = per_dir

    def gw(m, g):  # (H, H_in) rows of gate g (0=r, 1=z, 2=n)
        return m[g * H:(g + 1) * H]

    def gb(b, g):
        return b[g * H:(g + 1) * H]

    # gate-major columns: [r_f r_b | z_f z_b | n_f n_b]
    wi = jnp.concatenate([gw(wif, 0).T, gw(wib, 0).T,
                          gw(wif, 1).T, gw(wib, 1).T,
                          gw(wif, 2).T, gw(wib, 2).T], axis=1)            # (E, 6H)

    Z = jnp.zeros((H, H), jnp.float32)
    row_f = jnp.concatenate([gw(whf, 0).T, Z, gw(whf, 1).T, Z, gw(whf, 2).T, Z], axis=1)
    row_b = jnp.concatenate([Z, gw(whb, 0).T, Z, gw(whb, 1).T, Z, gw(whb, 2).T], axis=1)
    whbd = jnp.concatenate([row_f, row_b], axis=0)                        # (2H, 6H)

    # fold b_i + b_h for r and z; only b_in for n (b_hn sits inside r*(.))
    bgi = jnp.concatenate([gb(bif, 0) + gb(bhf, 0), gb(bib, 0) + gb(bhb, 0),
                           gb(bif, 1) + gb(bhf, 1), gb(bib, 1) + gb(bhb, 1),
                           gb(bif, 2),              gb(bib, 2)]).reshape(1, 6 * H)
    bhn = jnp.concatenate([jnp.zeros((4 * H,), jnp.float32),
                           gb(bhf, 2), gb(bhb, 2)]).reshape(1, 6 * H)

    return {"wi": wi, "bgi": bgi, "whbd": whbd, "bhn": bhn}


# ------------------------------ full forward ----------------------------------

def input_module_forward(contexts, word_embedding, gru_params):
    """contexts: (B, S, T) int32 ids; word_embedding: (V, E) -> facts (B, S, H)."""
    B, S, T = contexts.shape
    V, E = word_embedding.shape
    H = E

    # batch chunking: 2 "parallel" grid steps so v7x uses both TensorCores;
    # everything inside a step is batched over B_c rows.
    num_splits = 2 if (B >= 2 and B % 2 == 0) else 1
    B_c = B // num_splits

    # position-encoding table (same 0-based /(T-1),(E-1) formula as the module);
    # constant-folded by XLA under jit.
    s_idx = jnp.arange(T, dtype=jnp.float32)[:, None]
    e_idx = jnp.arange(E, dtype=jnp.float32)[None, :]
    pos = (1.0 - s_idx / (T - 1)
           - e_idx / (E - 1) * (1.0 - 2.0 * s_idx / (T - 1)))             # (T, E)
    pos = pos.reshape(T, 1, E).astype(jnp.float32)

    # fwd/bwd gate-column mask, gate-major blocks of width H (constant-folded)
    col = jnp.arange(6 * H, dtype=jnp.int32)
    fmask = (((col // H) % 2) == 0).astype(jnp.float32).reshape(1, 6 * H)

    # token ids -> chunk-major, token-major flat layout (tiny int glue on B*S*T
    # elements; the float (B,T,S,E) HBM intermediate of the old path is gone).
    ctx_t = jnp.transpose(contexts, (2, 0, 1)).reshape(T, num_splits, B_c, S)
    ctx_in = jnp.transpose(ctx_t, (1, 0, 2, 3)).reshape(
        num_splits, T * B_c * S, 1).astype(jnp.int32)

    vmem = pl.BlockSpec(memory_space=pltpu.MemorySpace.VMEM)  # small params, whole-array
    facts_chunks = pl.pallas_call(
        _input_module_kernel,
        out_shape=jax.ShapeDtypeStruct((num_splits, B_c, S * H), jnp.float32),
        grid=(num_splits,),
        in_specs=[
            pl.BlockSpec((1, T * B_c * S, 1), lambda c: (c, 0, 0)),  # ids per chunk
            vmem,   # embedding table (V, E) — resident in VMEM
            vmem,   # pos
            vmem,   # fmask
            vmem,   # wi
            vmem,   # bgi
            vmem,   # whbd
            vmem,   # bhn
        ],
        out_specs=pl.BlockSpec((1, B_c, S * H), lambda c: (c, 0, 0)),
        scratch_shapes=[pltpu.VMEM((B_c, S * H), jnp.float32)],
        compiler_params=pltpu.CompilerParams(
            dimension_semantics=("parallel",)),                     # both TCs on v7x
    )(ctx_in, word_embedding.astype(jnp.float32), pos, fmask,
      gru_params["wi"], gru_params["bgi"], gru_params["whbd"], gru_params["bhn"])

    return facts_chunks.reshape(B, S, H)   # free re-view of the lane-dense output


if __name__ == "__main__":
    key = jax.random.PRNGKey(0)
    k_emb, k_ctx, k_gru = jax.random.split(key, 3)

    B, S, T, V = 2, 4, 6, 50          # batch, sentences, tokens, vocab
    E = HIDDEN                        # embedding dim == hidden dim

    # nn.Embedding(vocab, hidden, padding_idx=0) with uniform(-sqrt(3), sqrt(3))
    word_embedding = jax.random.uniform(k_emb, (V, E), jnp.float32,
                                        -3.0 ** 0.5, 3.0 ** 0.5)
    word_embedding = word_embedding.at[0].set(0.0)
    contexts = jax.random.randint(k_ctx, (B, S, T), 0, V, dtype=jnp.int32)
    gru_params = init_gru_params(k_gru, HIDDEN)

    fwd = jax.jit(input_module_forward)
    facts = fwd(contexts, word_embedding, gru_params)
    facts = jax.block_until_ready(facts)
    assert facts.shape == (B, S, HIDDEN)
    assert bool(jnp.all(jnp.isfinite(facts)))
    print("KERNEL_OK")
</pallas_src>

<mosaic_0001>
module attributes {stable_mosaic.version = 11 : i64} {
  func.func @_input_module_kernel(%arg0: i32, %arg1: memref<1x24x1xi32, #tpu.memory_space<vmem>>, %arg2: memref<50x32xf32, #tpu.memory_space<vmem>>, %arg3: memref<6x1x32xf32, #tpu.memory_space<vmem>>, %arg4: memref<1x192xf32, #tpu.memory_space<vmem>>, %arg5: memref<32x192xf32, #tpu.memory_space<vmem>>, %arg6: memref<1x192xf32, #tpu.memory_space<vmem>>, %arg7: memref<64x192xf32, #tpu.memory_space<vmem>>, %arg8: memref<1x192xf32, #tpu.memory_space<vmem>>, %arg9: memref<1x1x128xf32, #tpu.memory_space<vmem>>, %arg10: memref<1x128xf32, #tpu.memory_space<vmem>>) attributes {dimension_semantics = [#tpu.dimension_semantics<parallel>], iteration_bounds = array<i64: 2>, scalar_prefetch = 0 : i64, scratch_operands = 1 : i64, tpu.core_type = #tpu.core_type<tc>, window_params = [{transform_indices = @transform_0, window_bounds = array<i64: 1, 24, 1>}, {pipeline_mode = #tpu.pipeline_mode<synchronous>, transform_indices = @transform_1, window_bounds = array<i64: 50, 32>}, {pipeline_mode = #tpu.pipeline_mode<synchronous>, transform_indices = @transform_2, window_bounds = array<i64: 6, 1, 32>}, {pipeline_mode = #tpu.pipeline_mode<synchronous>, transform_indices = @transform_3, window_bounds = array<i64: 1, 192>}, {pipeline_mode = #tpu.pipeline_mode<synchronous>, transform_indices = @transform_4, window_bounds = array<i64: 32, 192>}, {pipeline_mode = #tpu.pipeline_mode<synchronous>, transform_indices = @transform_5, window_bounds = array<i64: 1, 192>}, {pipeline_mode = #tpu.pipeline_mode<synchronous>, transform_indices = @transform_6, window_bounds = array<i64: 64, 192>}, {pipeline_mode = #tpu.pipeline_mode<synchronous>, transform_indices = @transform_7, window_bounds = array<i64: 1, 192>}, {transform_indices = @transform_8, window_bounds = array<i64: 1, 1, 128>}]} {
    %c0 = arith.constant 0 : index
    %c0_0 = arith.constant 0 : index
    %c0_1 = arith.constant 0 : index
    %0 = vector.load %arg1[%c0, %c0_0, %c0_1] : memref<1x24x1xi32, #tpu.memory_space<vmem>>, vector<1x24x1xi32>
    %1 = vector.shape_cast %0 : vector<1x24x1xi32> to vector<24x1xi32>
    %2 = tpu.iota {dimensions = array<i32: 1>} : vector<24x50xi32>
    %3 = vector.broadcast %1 : vector<24x1xi32> to vector<24x50xi32>
    %4 = arith.cmpi eq, %2, %3 : vector<24x50xi32>
    %5 = arith.extui %4 : vector<24x50xi1> to vector<24x50xi32>
    %6 = arith.sitofp %5 : vector<24x50xi32> to vector<24x50xf32>
    %c0_2 = arith.constant 0 : index
    %c0_3 = arith.constant 0 : index
    %7 = vector.load %arg2[%c0_2, %c0_3] : memref<50x32xf32, #tpu.memory_space<vmem>>, vector<50x32xf32>
    %cst = arith.constant dense<0.000000e+00> : vector<24x32xf32>
    %8 = tpu.matmul %6, %7, %cst {dimension_numbers = #tpu.dot_dimension_numbers<[1], [0], [0], [1], [0, 0, 1, 1], [], []>} : vector<24x50xf32>, vector<50x32xf32>, vector<24x32xf32> -> vector<24x32xf32>
    %9 = vector.extract_strided_slice %8 {offsets = [0, 0], sizes = [4, 32], strides = [1, 1]} : vector<24x32xf32> to vector<4x32xf32>
    %c0_4 = arith.constant 0 : index
    %c0_5 = arith.constant 0 : index
    %c0_6 = arith.constant 0 : index
    %10 = vector.load %arg3[%c0_4, %c0_5, %c0_6] : memref<6x1x32xf32, #tpu.memory_space<vmem>>, vector<1x1x32xf32>
    %11 = vector.shape_cast %10 : vector<1x1x32xf32> to vector<1x32xf32>
    %12 = vector.broadcast %11 : vector<1x32xf32> to vector<4x32xf32>
    %13 = arith.mulf %9, %12 : vector<4x32xf32>
    %14 = vector.extract_strided_slice %8 {offsets = [4, 0], sizes = [4, 32], strides = [1, 1]} : vector<24x32xf32> to vector<4x32xf32>
    %c1 = arith.constant 1 : index
    %c0_7 = arith.constant 0 : index
    %c0_8 = arith.constant 0 : index
    %15 = vector.load %arg3[%c1, %c0_7, %c0_8] : memref<6x1x32xf32, #tpu.memory_space<vmem>>, vector<1x1x32xf32>
    %16 = vector.shape_cast %15 : vector<1x1x32xf32> to vector<1x32xf32>
    %17 = vector.broadcast %16 : vector<1x32xf32> to vector<4x32xf32>
    %18 = arith.mulf %14, %17 : vector<4x32xf32>
    %19 = arith.addf %13, %18 : vector<4x32xf32>
    %20 = vector.extract_strided_slice %8 {offsets = [8, 0], sizes = [4, 32], strides = [1, 1]} : vector<24x32xf32> to vector<4x32xf32>
    %c2 = arith.constant 2 : index
    %c0_9 = arith.constant 0 : index
    %c0_10 = arith.constant 0 : index
    %21 = vector.load %arg3[%c2, %c0_9, %c0_10] : memref<6x1x32xf32, #tpu.memory_space<vmem>>, vector<1x1x32xf32>
    %22 = vector.shape_cast %21 : vector<1x1x32xf32> to vector<1x32xf32>
    %23 = vector.broadcast %22 : vector<1x32xf32> to vector<4x32xf32>
    %24 = arith.mulf %20, %23 : vector<4x32xf32>
    %25 = arith.addf %19, %24 : vector<4x32xf32>
    %26 = vector.extract_strided_slice %8 {offsets = [12, 0], sizes = [4, 32], strides = [1, 1]} : vector<24x32xf32> to vector<4x32xf32>
    %c3 = arith.constant 3 : index
    %c0_11 = arith.constant 0 : index
    %c0_12 = arith.constant 0 : index
    %27 = vector.load %arg3[%c3, %c0_11, %c0_12] : memref<6x1x32xf32, #tpu.memory_space<vmem>>, vector<1x1x32xf32>
    %28 = vector.shape_cast %27 : vector<1x1x32xf32> to vector<1x32xf32>
    %29 = vector.broadcast %28 : vector<1x32xf32> to vector<4x32xf32>
    %30 = arith.mulf %26, %29 : vector<4x32xf32>
    %31 = arith.addf %25, %30 : vector<4x32xf32>
    %32 = vector.extract_strided_slice %8 {offsets = [16, 0], sizes = [4, 32], strides = [1, 1]} : vector<24x32xf32> to vector<4x32xf32>
    %c4 = arith.constant 4 : index
    %c0_13 = arith.constant 0 : index
    %c0_14 = arith.constant 0 : index
    %33 = vector.load %arg3[%c4, %c0_13, %c0_14] : memref<6x1x32xf32, #tpu.memory_space<vmem>>, vector<1x1x32xf32>
    %34 = vector.shape_cast %33 : vector<1x1x32xf32> to vector<1x32xf32>
    %35 = vector.broadcast %34 : vector<1x32xf32> to vector<4x32xf32>
    %36 = arith.mulf %32, %35 : vector<4x32xf32>
    %37 = arith.addf %31, %36 : vector<4x32xf32>
    %38 = vector.extract_strided_slice %8 {offsets = [20, 0], sizes = [4, 32], strides = [1, 1]} : vector<24x32xf32> to vector<4x32xf32>
    %c5 = arith.constant 5 : index
    %c0_15 = arith.constant 0 : index
    %c0_16 = arith.constant 0 : index
    %39 = vector.load %arg3[%c5, %c0_15, %c0_16] : memref<6x1x32xf32, #tpu.memory_space<vmem>>, vector<1x1x32xf32>
    %40 = vector.shape_cast %39 : vector<1x1x32xf32> to vector<1x32xf32>
    %41 = vector.broadcast %40 : vector<1x32xf32> to vector<4x32xf32>
    %42 = arith.mulf %38, %41 : vector<4x32xf32>
    %43 = arith.addf %37, %42 : vector<4x32xf32>
    %c0_17 = arith.constant 0 : index
    %c0_18 = arith.constant 0 : index
    %44 = vector.load %arg5[%c0_17, %c0_18] : memref<32x192xf32, #tpu.memory_space<vmem>>, vector<32x192xf32>
    %cst_19 = arith.constant dense<0.000000e+00> : vector<4x192xf32>
    %45 = tpu.matmul %43, %44, %cst_19 {dimension_numbers = #tpu.dot_dimension_numbers<[1], [0], [0], [1], [0, 0, 1, 1], [], []>} : vector<4x32xf32>, vector<32x192xf32>, vector<4x192xf32> -> vector<4x192xf32>
    %c0_20 = arith.constant 0 : index
    %c0_21 = arith.constant 0 : index
    %46 = vector.load %arg6[%c0_20, %c0_21] : memref<1x192xf32, #tpu.memory_space<vmem>>, vector<1x192xf32>
    %47 = vector.broadcast %46 : vector<1x192xf32> to vector<4x192xf32>
    %48 = arith.addf %45, %47 : vector<4x192xf32>
    %49 = vector.shape_cast %48 : vector<4x192xf32> to vector<1x4x192xf32>
    %c0_22 = arith.constant 0 : index
    %c0_23 = arith.constant 0 : index
    %50 = vector.load %arg4[%c0_22, %c0_23] : memref<1x192xf32, #tpu.memory_space<vmem>>, vector<1x192xf32>
    %cst_24 = arith.constant 0.000000e+00 : f32
    %51 = vector.broadcast %cst_24 : f32 to vector<1x192xf32>
    %52 = arith.cmpf one, %50, %51 : vector<1x192xf32>
    %c0_25 = arith.constant 0 : index
    %c0_26 = arith.constant 0 : index
    %53 = vector.load %arg7[%c0_25, %c0_26] : memref<64x192xf32, #tpu.memory_space<vmem>>, vector<64x192xf32>
    %c0_27 = arith.constant 0 : index
    %c0_28 = arith.constant 0 : index
    %54 = vector.load %arg8[%c0_27, %c0_28] : memref<1x192xf32, #tpu.memory_space<vmem>>, vector<1x192xf32>
    %cst_29 = arith.constant 0.000000e+00 : f32
    %55 = vector.broadcast %cst_29 : f32 to vector<1x64xf32>
    %56 = vector.extract_strided_slice %49 {offsets = [0, 0, 0], sizes = [1, 1, 192], strides = [1, 1, 1]} : vector<1x4x192xf32> to vector<1x1x192xf32>
    %57 = vector.shape_cast %56 : vector<1x1x192xf32> to vector<1x192xf32>
    %58 = vector.extract_strided_slice %49 {offsets = [0, 3, 0], sizes = [1, 1, 192], strides = [1, 1, 1]} : vector<1x4x192xf32> to vector<1x1x192xf32>
    %59 = vector.shape_cast %58 : vector<1x1x192xf32> to vector<1x192xf32>
    %60 = arith.select %52, %57, %59 : vector<1x192xi1>, vector<1x192xf32>
    %cst_30 = arith.constant dense<0.000000e+00> : vector<1x192xf32>
    %61 = tpu.matmul %55, %53, %cst_30 {dimension_numbers = #tpu.dot_dimension_numbers<[1], [0], [0], [1], [0, 0, 1, 1], [], []>} : vector<1x64xf32>, vector<64x192xf32>, vector<1x192xf32> -> vector<1x192xf32>
    %62 = arith.addf %61, %54 : vector<1x192xf32>
    %63 = vector.extract_strided_slice %60 {offsets = [0, 0], sizes = [1, 128], strides = [1, 1]} : vector<1x192xf32> to vector<1x128xf32>
    %64 = vector.extract_strided_slice %62 {offsets = [0, 0], sizes = [1, 128], strides = [1, 1]} : vector<1x192xf32> to vector<1x128xf32>
    %65 = arith.addf %63, %64 : vector<1x128xf32>
    %66 = arith.negf %65 : vector<1x128xf32>
    %67 = math.exp %66 : vector<1x128xf32>
    %cst_31 = arith.constant 1.000000e+00 : f32
    %68 = vector.broadcast %cst_31 : f32 to vector<1x128xf32>
    %69 = arith.addf %68, %67 : vector<1x128xf32>
    %70 = arith.divf %68, %69 : vector<1x128xf32>
    %71 = vector.extract_strided_slice %70 {offsets = [0, 0], sizes = [1, 64], strides = [1, 1]} : vector<1x128xf32> to vector<1x64xf32>
    %72 = vector.extract_strided_slice %70 {offsets = [0, 64], sizes = [1, 64], strides = [1, 1]} : vector<1x128xf32> to vector<1x64xf32>
    %73 = vector.extract_strided_slice %60 {offsets = [0, 128], sizes = [1, 64], strides = [1, 1]} : vector<1x192xf32> to vector<1x64xf32>
    %74 = vector.extract_strided_slice %62 {offsets = [0, 128], sizes = [1, 64], strides = [1, 1]} : vector<1x192xf32> to vector<1x64xf32>
    %75 = arith.mulf %71, %74 : vector<1x64xf32>
    %76 = arith.addf %73, %75 : vector<1x64xf32>
    %77 = math.tanh %76 : vector<1x64xf32>
    %cst_32 = arith.constant 1.000000e+00 : f32
    %78 = vector.broadcast %cst_32 : f32 to vector<1x64xf32>
    %79 = arith.subf %78, %72 : vector<1x64xf32>
    %80 = arith.mulf %79, %77 : vector<1x64xf32>
    %81 = arith.mulf %72, %55 : vector<1x64xf32>
    %82 = arith.addf %80, %81 : vector<1x64xf32>
    %83 = vector.extract_strided_slice %82 {offsets = [0, 0], sizes = [1, 32], strides = [1, 1]} : vector<1x64xf32> to vector<1x32xf32>
    %c0_33 = arith.constant 0 : index
    %c0_34 = arith.constant 0 : index
    %c0_35 = arith.constant 0 : index
    %84 = vector.load %arg9[%c0_33, %c0_34, %c0_35] : memref<1x1x128xf32, #tpu.memory_space<vmem>>, vector<1x1x32xf32>
    %85 = vector.shape_cast %84 : vector<1x1x32xf32> to vector<1x32xf32>
    %86 = vector.shape_cast %83 : vector<1x32xf32> to vector<1x1x32xf32>
    tpu.vector_store %arg9[%c0_33, %c0_34, %c0_35], %86 {strides = array<i32>} : memref<1x1x128xf32, #tpu.memory_space<vmem>>, vector<1x1x32xf32>,
    %87 = vector.extract_strided_slice %82 {offsets = [0, 32], sizes = [1, 32], strides = [1, 1]} : vector<1x64xf32> to vector<1x32xf32>
    %c0_36 = arith.constant 0 : index
    %c96 = arith.constant 96 : index
    %88 = vector.load %arg10[%c0_36, %c96] : memref<1x128xf32, #tpu.memory_space<vmem>>, vector<1x32xf32>
    tpu.vector_store %arg10[%c0_36, %c96], %87 {strides = array<i32>} : memref<1x128xf32, #tpu.memory_space<vmem>>, vector<1x32xf32>,
    %89 = vector.extract_strided_slice %49 {offsets = [0, 1, 0], sizes = [1, 1, 192], strides = [1, 1, 1]} : vector<1x4x192xf32> to vector<1x1x192xf32>
    %90 = vector.shape_cast %89 : vector<1x1x192xf32> to vector<1x192xf32>
    %91 = vector.extract_strided_slice %49 {offsets = [0, 2, 0], sizes = [1, 1, 192], strides = [1, 1, 1]} : vector<1x4x192xf32> to vector<1x1x192xf32>
    %92 = vector.shape_cast %91 : vector<1x1x192xf32> to vector<1x192xf32>
    %93 = arith.select %52, %90, %92 : vector<1x192xi1>, vector<1x192xf32>
    %cst_37 = arith.constant dense<0.000000e+00> : vector<1x192xf32>
    %94 = tpu.matmul %82, %53, %cst_37 {dimension_numbers = #tpu.dot_dimension_numbers<[1], [0], [0], [1], [0, 0, 1, 1], [], []>} : vector<1x64xf32>, vector<64x192xf32>, vector<1x192xf32> -> vector<1x192xf32>
    %95 = arith.addf %94, %54 : vector<1x192xf32>
    %96 = vector.extract_strided_slice %93 {offsets = [0, 0], sizes = [1, 128], strides = [1, 1]} : vector<1x192xf32> to vector<1x128xf32>
    %97 = vector.extract_strided_slice %95 {offsets = [0, 0], sizes = [1, 128], strides = [1, 1]} : vector<1x192xf32> to vector<1x128xf32>
    %98 = arith.addf %96, %97 : vector<1x128xf32>
    %99 = arith.negf %98 : vector<1x128xf32>
    %100 = math.exp %99 : vector<1x128xf32>
    %cst_38 = arith.constant 1.000000e+00 : f32
    %101 = vector.broadcast %cst_38 : f32 to vector<1x128xf32>
    %102 = arith.addf %101, %100 : vector<1x128xf32>
    %103 = arith.divf %101, %102 : vector<1x128xf32>
    %104 = vector.extract_strided_slice %103 {offsets = [0, 0], sizes = [1, 64], strides = [1, 1]} : vector<1x128xf32> to vector<1x64xf32>
    %105 = vector.extract_strided_slice %103 {offsets = [0, 64], sizes = [1, 64], strides = [1, 1]} : vector<1x128xf32> to vector<1x64xf32>
    %106 = vector.extract_strided_slice %93 {offsets = [0, 128], sizes = [1, 64], strides = [1, 1]} : vector<1x192xf32> to vector<1x64xf32>
    %107 = vector.extract_strided_slice %95 {offsets = [0, 128], sizes = [1, 64], strides = [1, 1]} : vector<1x192xf32> to vector<1x64xf32>
    %108 = arith.mulf %104, %107 : vector<1x64xf32>
    %109 = arith.addf %106, %108 : vector<1x64xf32>
    %110 = math.tanh %109 : vector<1x64xf32>
    %cst_39 = arith.constant 1.000000e+00 : f32
    %111 = vector.broadcast %cst_39 : f32 to vector<1x64xf32>
    %112 = arith.subf %111, %105 : vector<1x64xf32>
    %113 = arith.mulf %112, %110 : vector<1x64xf32>
    %114 = arith.mulf %105, %82 : vector<1x64xf32>
    %115 = arith.addf %113, %114 : vector<1x64xf32>
    %116 = vector.extract_strided_slice %115 {offsets = [0, 0], sizes = [1, 32], strides = [1, 1]} : vector<1x64xf32> to vector<1x32xf32>
    %c0_40 = arith.constant 0 : index
    %c0_41 = arith.constant 0 : index
    %c32 = arith.constant 32 : index
    %117 = vector.load %arg9[%c0_40, %c0_41, %c32] : memref<1x1x128xf32, #tpu.memory_space<vmem>>, vector<1x1x32xf32>
    %118 = vector.shape_cast %117 : vector<1x1x32xf32> to vector<1x32xf32>
    %119 = vector.shape_cast %116 : vector<1x32xf32> to vector<1x1x32xf32>
    tpu.vector_store %arg9[%c0_40, %c0_41, %c32], %119 {strides = array<i32>} : memref<1x1x128xf32, #tpu.memory_space<vmem>>, vector<1x1x32xf32>,
    %120 = vector.extract_strided_slice %115 {offsets = [0, 32], sizes = [1, 32], strides = [1, 1]} : vector<1x64xf32> to vector<1x32xf32>
    %c0_42 = arith.constant 0 : index
    %c64 = arith.constant 64 : index
    %121 = vector.load %arg10[%c0_42, %c64] : memref<1x128xf32, #tpu.memory_space<vmem>>, vector<1x32xf32>
    tpu.vector_store %arg10[%c0_42, %c64], %120 {strides = array<i32>} : memref<1x128xf32, #tpu.memory_space<vmem>>, vector<1x32xf32>,
    %122 = vector.extract_strided_slice %49 {offsets = [0, 2, 0], sizes = [1, 1, 192], strides = [1, 1, 1]} : vector<1x4x192xf32> to vector<1x1x192xf32>
    %123 = vector.shape_cast %122 : vector<1x1x192xf32> to vector<1x192xf32>
    %124 = vector.extract_strided_slice %49 {offsets = [0, 1, 0], sizes = [1, 1, 192], strides = [1, 1, 1]} : vector<1x4x192xf32> to vector<1x1x192xf32>
    %125 = vector.shape_cast %124 : vector<1x1x192xf32> to vector<1x192xf32>
    %126 = arith.select %52, %123, %125 : vector<1x192xi1>, vector<1x192xf32>
    %cst_43 = arith.constant dense<0.000000e+00> : vector<1x192xf32>
    %127 = tpu.matmul %115, %53, %cst_43 {dimension_numbers = #tpu.dot_dimension_numbers<[1], [0], [0], [1], [0, 0, 1, 1], [], []>} : vector<1x64xf32>, vector<64x192xf32>, vector<1x192xf32> -> vector<1x192xf32>
    %128 = arith.addf %127, %54 : vector<1x192xf32>
    %129 = vector.extract_strided_slice %126 {offsets = [0, 0], sizes = [1, 128], strides = [1, 1]} : vector<1x192xf32> to vector<1x128xf32>
    %130 = vector.extract_strided_slice %128 {offsets = [0, 0], sizes = [1, 128], strides = [1, 1]} : vector<1x192xf32> to vector<1x128xf32>
    %131 = arith.addf %129, %130 : vector<1x128xf32>
    %132 = arith.negf %131 : vector<1x128xf32>
    %133 = math.exp %132 : vector<1x128xf32>
    %cst_44 = arith.constant 1.000000e+00 : f32
    %134 = vector.broadcast %cst_44 : f32 to vector<1x128xf32>
    %135 = arith.addf %134, %133 : vector<1x128xf32>
    %136 = arith.divf %134, %135 : vector<1x128xf32>
    %137 = vector.extract_strided_slice %136 {offsets = [0, 0], sizes = [1, 64], strides = [1, 1]} : vector<1x128xf32> to vector<1x64xf32>
    %138 = vector.extract_strided_slice %136 {offsets = [0, 64], sizes = [1, 64], strides = [1, 1]} : vector<1x128xf32> to vector<1x64xf32>
    %139 = vector.extract_strided_slice %126 {offsets = [0, 128], sizes = [1, 64], strides = [1, 1]} : vector<1x192xf32> to vector<1x64xf32>
    %140 = vector.extract_strided_slice %128 {offsets = [0, 128], sizes = [1, 64], strides = [1, 1]} : vector<1x192xf32> to vector<1x64xf32>
    %141 = arith.mulf %137, %140 : vector<1x64xf32>
    %142 = arith.addf %139, %141 : vector<1x64xf32>
    %143 = math.tanh %142 : vector<1x64xf32>
    %cst_45 = arith.constant 1.000000e+00 : f32
    %144 = vector.broadcast %cst_45 : f32 to vector<1x64xf32>
    %145 = arith.subf %144, %138 : vector<1x64xf32>
    %146 = arith.mulf %145, %143 : vector<1x64xf32>
    %147 = arith.mulf %138, %115 : vector<1x64xf32>
    %148 = arith.addf %146, %147 : vector<1x64xf32>
    %149 = vector.extract_strided_slice %148 {offsets = [0, 0], sizes = [1, 32], strides = [1, 1]} : vector<1x64xf32> to vector<1x32xf32>
    %c0_46 = arith.constant 0 : index
    %c0_47 = arith.constant 0 : index
    %c64_48 = arith.constant 64 : index
    %150 = vector.load %arg9[%c0_46, %c0_47, %c64_48] : memref<1x1x128xf32, #tpu.memory_space<vmem>>, vector<1x1x32xf32>
    %151 = vector.shape_cast %150 : vector<1x1x32xf32> to vector<1x32xf32>
    %152 = vector.shape_cast %149 : vector<1x32xf32> to vector<1x1x32xf32>
    tpu.vector_store %arg9[%c0_46, %c0_47, %c64_48], %152 {strides = array<i32>} : memref<1x1x128xf32, #tpu.memory_space<vmem>>, vector<1x1x32xf32>,
    %153 = vector.extract_strided_slice %148 {offsets = [0, 32], sizes = [1, 32], strides = [1, 1]} : vector<1x64xf32> to vector<1x32xf32>
    %c0_49 = arith.constant 0 : index
    %c32_50 = arith.constant 32 : index
    %154 = vector.load %arg10[%c0_49, %c32_50] : memref<1x128xf32, #tpu.memory_space<vmem>>, vector<1x32xf32>
    tpu.vector_store %arg10[%c0_49, %c32_50], %153 {strides = array<i32>} : memref<1x128xf32, #tpu.memory_space<vmem>>, vector<1x32xf32>,
    %155 = vector.extract_strided_slice %49 {offsets = [0, 3, 0], sizes = [1, 1, 192], strides = [1, 1, 1]} : vector<1x4x192xf32> to vector<1x1x192xf32>
    %156 = vector.shape_cast %155 : vector<1x1x192xf32> to vector<1x192xf32>
    %157 = vector.extract_strided_slice %49 {offsets = [0, 0, 0], sizes = [1, 1, 192], strides = [1, 1, 1]} : vector<1x4x192xf32> to vector<1x1x192xf32>
    %158 = vector.shape_cast %157 : vector<1x1x192xf32> to vector<1x192xf32>
    %159 = arith.select %52, %156, %158 : vector<1x192xi1>, vector<1x192xf32>
    %cst_51 = arith.constant dense<0.000000e+00> : vector<1x192xf32>
    %160 = tpu.matmul %148, %53, %cst_51 {dimension_numbers = #tpu.dot_dimension_numbers<[1], [0], [0], [1], [0, 0, 1, 1], [], []>} : vector<1x64xf32>, vector<64x192xf32>, vector<1x192xf32> -> vector<1x192xf32>
    %161 = arith.addf %160, %54 : vector<1x192xf32>
    %162 = vector.extract_strided_slice %159 {offsets = [0, 0], sizes = [1, 128], strides = [1, 1]} : vector<1x192xf32> to vector<1x128xf32>
    %163 = vector.extract_strided_slice %161 {offsets = [0, 0], sizes = [1, 128], strides = [1, 1]} : vector<1x192xf32> to vector<1x128xf32>
    %164 = arith.addf %162, %163 : vector<1x128xf32>
    %165 = arith.negf %164 : vector<1x128xf32>
    %166 = math.exp %165 : vector<1x128xf32>
    %cst_52 = arith.constant 1.000000e+00 : f32
    %167 = vector.broadcast %cst_52 : f32 to vector<1x128xf32>
    %168 = arith.addf %167, %166 : vector<1x128xf32>
    %169 = arith.divf %167, %168 : vector<1x128xf32>
    %170 = vector.extract_strided_slice %169 {offsets = [0, 0], sizes = [1, 64], strides = [1, 1]} : vector<1x128xf32> to vector<1x64xf32>
    %171 = vector.extract_strided_slice %169 {offsets = [0, 64], sizes = [1, 64], strides = [1, 1]} : vector<1x128xf32> to vector<1x64xf32>
    %172 = vector.extract_strided_slice %159 {offsets = [0, 128], sizes = [1, 64], strides = [1, 1]} : vector<1x192xf32> to vector<1x64xf32>
    %173 = vector.extract_strided_slice %161 {offsets = [0, 128], sizes = [1, 64], strides = [1, 1]} : vector<1x192xf32> to vector<1x64xf32>
    %174 = arith.mulf %170, %173 : vector<1x64xf32>
    %175 = arith.addf %172, %174 : vector<1x64xf32>
    %176 = math.tanh %175 : vector<1x64xf32>
    %cst_53 = arith.constant 1.000000e+00 : f32
    %177 = vector.broadcast %cst_53 : f32 to vector<1x64xf32>
    %178 = arith.subf %177, %171 : vector<1x64xf32>
    %179 = arith.mulf %178, %176 : vector<1x64xf32>
    %180 = arith.mulf %171, %148 : vector<1x64xf32>
    %181 = arith.addf %179, %180 : vector<1x64xf32>
    %182 = vector.extract_strided_slice %181 {offsets = [0, 0], sizes = [1, 32], strides = [1, 1]} : vector<1x64xf32> to vector<1x32xf32>
    %c0_54 = arith.constant 0 : index
    %c0_55 = arith.constant 0 : index
    %c96_56 = arith.constant 96 : index
    %183 = vector.load %arg9[%c0_54, %c0_55, %c96_56] : memref<1x1x128xf32, #tpu.memory_space<vmem>>, vector<1x1x32xf32>
    %184 = vector.shape_cast %183 : vector<1x1x32xf32> to vector<1x32xf32>
    %185 = vector.shape_cast %182 : vector<1x32xf32> to vector<1x1x32xf32>
    tpu.vector_store %arg9[%c0_54, %c0_55, %c96_56], %185 {strides = array<i32>} : memref<1x1x128xf32, #tpu.memory_space<vmem>>, vector<1x1x32xf32>,
    %186 = vector.extract_strided_slice %181 {offsets = [0, 32], sizes = [1, 32], strides = [1, 1]} : vector<1x64xf32> to vector<1x32xf32>
    %c0_57 = arith.constant 0 : index
    %c0_58 = arith.constant 0 : index
    %187 = vector.load %arg10[%c0_57, %c0_58] : memref<1x128xf32, #tpu.memory_space<vmem>>, vector<1x32xf32>
    tpu.vector_store %arg10[%c0_57, %c0_58], %186 {strides = array<i32>} : memref<1x128xf32, #tpu.memory_space<vmem>>, vector<1x32xf32>,
    %c0_59 = arith.constant 0 : index
    %c0_60 = arith.constant 0 : index
    %c0_61 = arith.constant 0 : index
    %188 = vector.load %arg9[%c0_59, %c0_60, %c0_61] : memref<1x1x128xf32, #tpu.memory_space<vmem>>, vector<1x1x128xf32>
    %189 = vector.shape_cast %188 : vector<1x1x128xf32> to vector<1x128xf32>
    %c0_62 = arith.constant 0 : index
    %c0_63 = arith.constant 0 : index
    %190 = vector.load %arg10[%c0_62, %c0_63] : memref<1x128xf32, #tpu.memory_space<vmem>>, vector<1x128xf32>
    %191 = arith.addf %189, %190 : vector<1x128xf32>
    %c0_64 = arith.constant 0 : index
    %c0_65 = arith.constant 0 : index
    %c0_66 = arith.constant 0 : index
    %192 = vector.load %arg9[%c0_64, %c0_65, %c0_66] : memref<1x1x128xf32, #tpu.memory_space<vmem>>, vector<1x1x128xf32>
    %193 = vector.shape_cast %192 : vector<1x1x128xf32> to vector<1x128xf32>
    %194 = vector.shape_cast %191 : vector<1x128xf32> to vector<1x1x128xf32>
    tpu.vector_store %arg9[%c0_64, %c0_65, %c0_66], %194 {strides = array<i32>} : memref<1x1x128xf32, #tpu.memory_space<vmem>>, vector<1x1x128xf32>,
    return
  }
  func.func @transform_0(%arg0: i32) -> (i32, i32, i32) {
    %c0_i32 = arith.constant 0 : i32
    %c0_i32_0 = arith.constant 0 : i32
    %c0_i32_1 = arith.constant 0 : i32
    return %arg0, %c0_i32, %c0_i32_0 : i32, i32, i32
  }
  func.func @transform_1(%arg0: i32) -> (i32, i32) {
    %c0_i32 = arith.constant 0 : i32
    %c0_i32_0 = arith.constant 0 : i32
    %c0_i32_1 = arith.constant 0 : i32
    return %c0_i32, %c0_i32_0 : i32, i32
  }
  func.func @transform_2(%arg0: i32) -> (i32, i32, i32) {
    %c0_i32 = arith.constant 0 : i32
    %c0_i32_0 = arith.constant 0 : i32
    %c0_i32_1 = arith.constant 0 : i32
    %c0_i32_2 = arith.constant 0 : i32
    return %c0_i32, %c0_i32_0, %c0_i32_1 : i32, i32, i32
  }
  func.func @transform_3(%arg0: i32) -> (i32, i32) {
    %c0_i32 = arith.constant 0 : i32
    %c0_i32_0 = arith.constant 0 : i32
    %c0_i32_1 = arith.constant 0 : i32
    return %c0_i32, %c0_i32_0 : i32, i32
  }
  func.func @transform_4(%arg0: i32) -> (i32, i32) {
    %c0_i32 = arith.constant 0 : i32
    %c0_i32_0 = arith.constant 0 : i32
    %c0_i32_1 = arith.constant 0 : i32
    return %c0_i32, %c0_i32_0 : i32, i32
  }
  func.func @transform_5(%arg0: i32) -> (i32, i32) {
    %c0_i32 = arith.constant 0 : i32
    %c0_i32_0 = arith.constant 0 : i32
    %c0_i32_1 = arith.constant 0 : i32
    return %c0_i32, %c0_i32_0 : i32, i32
  }
  func.func @transform_6(%arg0: i32) -> (i32, i32) {
    %c0_i32 = arith.constant 0 : i32
    %c0_i32_0 = arith.constant 0 : i32
    %c0_i32_1 = arith.constant 0 : i32
    return %c0_i32, %c0_i32_0 : i32, i32
  }
  func.func @transform_7(%arg0: i32) -> (i32, i32) {
    %c0_i32 = arith.constant 0 : i32
    %c0_i32_0 = arith.constant 0 : i32
    %c0_i32_1 = arith.constant 0 : i32
    return %c0_i32, %c0_i32_0 : i32, i32
  }
  func.func @transform_8(%arg0: i32) -> (i32, i32, i32) {
    %c0_i32 = arith.constant 0 : i32
    %c0_i32_0 = arith.constant 0 : i32
    %c0_i32_1 = arith.constant 0 : i32
    return %arg0, %c0_i32, %c0_i32_0 : i32, i32, i32
  }
}

</mosaic_0001>

<bundles_post_ra>
// kernel: input_module_forward.1
= control target key start
LH: loop header
LB: loop body
LE: loop exit
PB: predicated region body
PF: predicated region fallthrough
CT: control target
= control target key end

     0   :  { %s1380_s27 = smov 0   ;;  %s1637_s0 = inlined_call_operand.vmem [shape: s32[2,24,1], index: 0, kind: input, shape index: {}]   ;;  %s1638_s1 = inlined_call_operand.vmem [shape: f32[50,32], index: 1, kind: input, shape index: {}]   ;;  %s1639_s2 = inlined_call_operand.vmem [shape: f32[6,1,32], index: 2, kind: input, shape index: {}]   ;;  %s1640_s3 = inlined_call_operand.vmem [shape: f32[1,192], index: 3, kind: input, shape index: {}]   ;;  %s1641_s4 = inlined_call_operand.vmem [shape: f32[32,192], index: 4, kind: input, shape index: {}]   ;;  %s1642_s5 = inlined_call_operand.vmem [shape: f32[1,192], index: 5, kind: input, shape index: {}]   ;;  %s1643_s6 = inlined_call_operand.vmem [shape: f32[64,192], index: 6, kind: input, shape index: {}]   ;;  %s1644_s7 = inlined_call_operand.vmem [shape: f32[1,192], index: 7, kind: input, shape index: {}]   ;;  %s1645_s8 = inlined_call_operand.vmem [shape: f32[2,1,128], index: 8, kind: output, shape index: {}]  }
   0x1 LB: > { %s1128_s28 = sadd.s32 4294967295, %s1325_s27   ;;  %p1132_p0 = scmp.ge.s32.totalorder %s1325_s27, 1  ;;  %s1325_s27 = sphi %s1380_s27, %s18_s27  }
   0x2   : > { %p262_p1 = scmp.lt.s32.totalorder %s1325_s27, 3 }
   0x4   : > { %p263_p2 = pnand %p1132_p0, %p262_p1 }
   0x5   : > { %p294_p3 = scmp.lt.s32.totalorder (!%p263_p2), %s1128_s28, 1  ;;  %v325_v0 = vld [vmem:[%s1638_s1] sm:$0xff] (!%p263_p2)  ;;  %v326_v1 = vld [vmem:[%s1638_s1 + $0x8] sm:$0xff] (!%p263_p2)  ;;  %v327_v2 = vld [vmem:[%s1638_s1 + $0x10] sm:$0xff] (!%p263_p2)  ;;  %v1327_v3 = vmov (!%p263_p2), 0   ;;  %v1328_v6 = vmov (!%p263_p2), 0.0|0.0   ;;  %v305_v16 = vlaneseq (!%p263_p2) }
   0x6   : > { %266 = sbr.rel (%p263_p2) target bundleno = 2374 (0x946), region = 52  ;;  %1293 = vset.pattern.permute.xlu0 (!%p263_p2), %v1327_v3  ;;  %1294 = vset.pattern.permute.xlu1 (!%p263_p2), %v1327_v3  ;;  %v1196_v4 = vpack.c.bf16 (!%p263_p2), %v326_v1, %v325_v0  ;;  %v328_v5 = vld [vmem:[%s1638_s1 + $0x18] sm:$0xff] (!%p263_p2)  ;;  %v1329_v7 = vmov (!%p263_p2), 0.0   ;;  %v329_v9 = vld [vmem:[%s1638_s1 + $0x20] sm:$0xff] (!%p263_p2)  ;;  %v330_v10 = vld [vmem:[%s1638_s1 + $0x28] sm:$0xff] (!%p263_p2)  ;;  %vm1330_vm0 = vmmov (!%p263_p2), 0  }
   0x7   : > { %1195 = vmatprep.subr.bf16.mxu0 (!%p263_p2), %v1328_v6  ;;  %581 = vmatprep.mubr.f32.mxu1 (!%p263_p2), %v1329_v7  ;;  %v1199_v8 = vpack.c.bf16 (!%p263_p2), %v328_v5, %v327_v2  ;;  %v1202_v13 = vpack.c.bf16 (!%p263_p2), %v330_v10, %v329_v9  ;;  %v331_v15 = vld [vmem:[%s1638_s1 + $0x30] sm:$0x3] (!%p263_p2)  ;;  %vm342_vm1 = vcmask (!%p263_p2), 1041408   ;;  %v306_v17 = vand.u32 (!%p263_p2), 127, %v305_v16  ;;  %v494_v24 = vld [vmem:[%s1641_s4 + $0x8] sm:$0xff] (!%p263_p2)  ;;  %v496_v25 = vld [vmem:[%s1641_s4 + $0x18] sm:$0xff] (!%p263_p2) }
   0x8   : > { %1197 = vmatpush3.bf16.msra.mxu0 (!%p263_p2), %v1196_v4  ;;  %1186 = vmatprep.mubr.msk.f32.mxu0 (!%p263_p2), %vm1330_vm0, %v1329_v7  ;;  %vm332_vm2 = vcmask (!%p263_p2), 408576   ;;  %v1204_v26 = vpack.c.bf16 (!%p263_p2), %v496_v25, %v494_v24  ;;  %v493_v27 = vld [vmem:[%s1641_s4] sm:$0xff] (!%p263_p2)  ;;  %v495_v28 = vld [vmem:[%s1641_s4 + $0x10] sm:$0xff] (!%p263_p2)  ;;  %v498_v30 = vld [vmem:[%s1641_s4 + $0x28] sm:$0xff] (!%p263_p2)  ;;  %vm513_vm6 = vcmask (!%p263_p2), 261120   ;;  %v504_v24 = vshrl.u32 (!%p263_p2), %v305_v16, 7 }
   0x9   : > { %1198 = vmatprep.subr.bf16.mxu0 (!%p263_p2), %v1328_v6  ;;  %v1206_v29 = vpack.c.bf16 (!%p263_p2), %v495_v28, %v493_v27  ;;  %v500_v31 = vld [vmem:[%s1641_s4 + $0x38] sm:$0xff] (!%p263_p2)  ;;  %v497_v33 = vld [vmem:[%s1641_s4 + $0x20] sm:$0xff] (!%p263_p2)  ;;  %v499_v34 = vld [vmem:[%s1641_s4 + $0x30] sm:$0xff] (!%p263_p2)  ;;  %v1331_v28 = vmov (!%p263_p2), 1966171168   ;;  %s1332_s11 = smov (!%p263_p2), 64  }
   0xa   : > { %1205 = vmatprep.subr.bf16.mxu1 (!%p263_p2), %v1204_v26  ;;  %v1208_v32 = vpack.c.bf16 (!%p263_p2), %v500_v31, %v498_v30  ;;  %v1210_v35 = vpack.c.bf16 (!%p263_p2), %v499_v34, %v497_v33  ;;  %v591_v36 = vld [vmem:[%s1643_s6 + $0x8] sm:$0xff] (!%p263_p2)  ;;  %v593_v37 = vld [vmem:[%s1643_s6 + $0x18] sm:$0xff] (!%p263_p2)  ;;  %v590_v39 = vld [vmem:[%s1643_s6] sm:$0xff] (!%p263_p2)  ;;  %v1563_v25 = vsub.s32 (!%p263_p2), 0, %v504_v24  ;;  %v509_v27 = vsub.s32 (!%p263_p2), 1, %v504_v24 }
   0xb   : > { %1207 = vmatpush1.bf16.msra.mxu1 (!%p263_p2), %v1206_v29  ;;  %v1458_v38 = vpack.c.bf16 (!%p263_p2), %v593_v37, %v591_v36  ;;  %v592_v40 = vld [vmem:[%s1643_s6 + $0x10] sm:$0xff] (!%p263_p2)  ;;  %v595_v42 = vld [vmem:[%s1643_s6 + $0x28] sm:$0xff] (!%p263_p2)  ;;  %v597_v43 = vld [vmem:[%s1643_s6 + $0x38] sm:$0xff] (!%p263_p2)  ;;  %v611_v29 = vunpack.c.l.s4 (!%p263_p2), %v1331_v28  ;;  %vm753_vm8 = vcmask (!%p263_p2), 1041152   ;;  %vm751_vm9 = vcmask (!%p263_p2), 253952  }
   0xc   : > { %1200 = vmatpush3.bf16.msra.mxu0 (!%p263_p2), %v1199_v8  ;;  %1209 = vmatprep.subr.bf16.mxu1 (!%p263_p2), %v1208_v32  ;;  %v1466_v41 = vpack.c.bf16 (!%p263_p2), %v592_v40, %v590_v39  ;;  %v1477_v44 = vpack.c.bf16 (!%p263_p2), %v597_v43, %v595_v42  ;;  %v594_v45 = vld [vmem:[%s1643_s6 + $0x20] sm:$0xff] (!%p263_p2)  ;;  %v596_v46 = vld [vmem:[%s1643_s6 + $0x30] sm:$0xff] (!%p263_p2)  ;;  %v599_v48 = vld [vmem:[%s1643_s6 + $0x48] sm:$0xff] (!%p263_p2)  ;;  %vm647_vm10 = vcmask (!%p263_p2), 523264   ;;  %vm861_vm11 = vcmask (!%p263_p2), 516352  }
   0xd   : > { %s1647_s28 = smov (!%p294_p3, %s1128_s28), 1  ;;  %1201 = vmatprep.subr.bf16.mxu0 %v1328_v6  ;;  %v1485_v47 = vpack.c.bf16 %v596_v46, %v594_v45  ;;  %v601_v49 = vld [vmem:[%s1643_s6 + $0x58] sm:$0xff]  ;;  %v598_v51 = vld [vmem:[%s1643_s6 + $0x40] sm:$0xff]  ;;  %v600_v52 = vld [vmem:[%s1643_s6 + $0x50] sm:$0xff]  ;;  %v612_v32 = vunpack.c.0.s8 %v611_v29  ;;  %vm863_vm12 = vcmask 778752  }
   0xe   : > { %s1276_s15 = smul.u32 24, %s1647_s28  ;;  %v1495_v50 = vpack.c.bf16 %v601_v49, %v599_v48  ;;  %v1503_v53 = vpack.c.bf16 %v600_v52, %v598_v51  ;;  %v603_v54 = vld [vmem:[%s1643_s6 + $0x68] sm:$0xff]  ;;  %v605_v55 = vld [vmem:[%s1643_s6 + $0x78] sm:$0xff]  ;;  %v602_v57 = vld [vmem:[%s1643_s6 + $0x60] sm:$0xff]  ;;  %s1594_s14 = scalar_lea.vmem %s1645_s8, %s1647_s28 }
   0xf   : > { %1211 = vmatpush1.bf16.msra.mxu1 %v1210_v35  ;;  %v1513_v56 = vpack.c.bf16 %v605_v55, %v603_v54  ;;  %v604_v58 = vld [vmem:[%s1643_s6 + $0x70] sm:$0xff]  ;;  %v1143_v60 = vld [vmem:[%s1639_s2 + $0x1] ss:$0 sm:$0xff]  ;;  %v1141_v62 = vld [vmem:[%s1639_s2] ss:$0 sm:$0xff]  ;;  %v615_v37 = vsub.s32 %v612_v32, %v504_v24  ;;  %s1333_s28 = smov 96  }
  0x10   : > { %s298_s22 = scalar_lea.vmem %s1637_s0, %s1276_s15  ;;  %1203 = vmatpush3.bf16.msra.mxu0 %v1202_v13  ;;  %1213 = vmatprep.subr.bf16.mxu1 %v1458_v38  ;;  %v1521_v59 = vpack.c.bf16 %v604_v58, %v602_v57  ;;  %v1145_v1 = vld [vmem:[%s1639_s2 + $0x2] ss:$0 sm:$0xff]  ;;  %v1147_v2 = vld [vmem:[%s1639_s2 + $0x3] ss:$0 sm:$0xff]  ;;  %v501_v26 = vld [vmem:[%s1642_s5] sm:$0x3] }
  0x11   : > { %v302_v11 = vld [vmem:[%s298_s22] sm:$0xff]  ;;  %v304_v12 = vld [vmem:[%s298_s22 + $0x10] sm:$0xff]  ;;  %v303_v14 = vld [vmem:[%s298_s22 + $0x8] sm:$0xff]  ;;  %1184 = vmatprep.subr.mxu0 %v1329_v7  ;;  %v506_v30 = vrot.slane %v501_v26, %v1563_v25  ;;  %v510_v31 = vrot.slane %v501_v26, %v509_v27  ;;  %s1334_s15 = smov 32  }
  0x12   : > { %308 = vperm.xlu0 %1293, %v302_v11   ;;  %314 = vperm.xlu1 %1294, %v304_v12   ;;  %v1149_v11 = vld [vmem:[%s1639_s2 + $0x4] ss:$0 sm:$0xff]  ;;  %v1151_v12 = vld [vmem:[%s1639_s2 + $0x5] ss:$0 sm:$0xff]  ;;  %v588_v39 = vld [vmem:[%s1640_s3] sm:$0x3] }
  0x13   : > { %vm589_vm7 = vcmp.ne.f32.partialorder %v588_v39, 0.0  ;;  %v606_v43 = vld [vmem:[%s1644_s7] sm:$0x3] }
  0x14   : > { %1185 = vmatpush3.msk.msra.mxu0 %vm342_vm1, %v331_v15  ;;  %v1578_v52 = vrot.slane %v606_v43, %v1563_v25 }
  0x15   : > { %1229 = vmatprep.subr.bf16.mxu0 %v1458_v38 }
  0x16   : > { %311 = vperm.xlu0 %1293, %v303_v14  }
  0x91   : > { %v309_v18 = vpop.permute.xlu0 %308  ;;  %v315_v20 = vpop.permute.xlu1 %314 }
  0x92   : > { %vm316_vm3 = vcmp.eq.s32.totalorder %v306_v17, %v309_v18  ;;  %vm318_vm5 = vcmp.eq.s32.totalorder %v306_v17, %v315_v20 }
  0x93   : > { %v1134_v19 = vsel %vm316_vm3, 1.0, %v1329_v7  ;;  %v1136_v23 = vsel %vm318_vm5, 1.0, %v1329_v7 }
  0x94   : > { %1187 = vmatmul.mubr.msk.f32.vlgmr.msra.gmra.mrb[0].mxu0 %vm332_vm2, %v1134_v19 }
  0x95   : > { %v312_v21 = vpop.permute.xlu0 %311  ;;  %1189 = vmatprep.mubr.msk.f32.mxu0 %vm1330_vm0, %v1329_v7  ;;  %1231 = vmatpush1.bf16.msra.mxu0 %v1466_v41 }
  0x96   : > { %vm317_vm4 = vcmp.eq.s32.totalorder %v306_v17, %v312_v21  ;;  %1233 = vmatprep.subr.bf16.mxu0 %v1477_v44 }
  0x97   : > { %v1135_v22 = vsel %vm317_vm4, 1.0, %v1329_v7 }
  0x98   : > { %1190 = vmatmul.mubr.msk.f32.gmra.mrb[2].mxu0 %vm332_vm2, %v1135_v22 }
  0x99   : > { %1192 = vmatprep.mubr.msk.f32.mxu0 %vm1330_vm0, %v1329_v7  ;;  %1235 = vmatpush1.bf16.msra.mxu0 %v1485_v47 }
  0x9a   : > { %1237 = vmatprep.subr.bf16.mxu0 %v1495_v50 }
  0x9c   : > { %1193 = vmatmul.mubr.msk.f32.gmra.mrb[4].mxu0 %vm332_vm2, %v1136_v23 }
  0x9d   : > { %825 = vmatprep.mubr.f32.mxu0 %v1329_v7  ;;  %1239 = vmatpush1.bf16.msra.mxu0 %v1503_v53 }
  0x9e   : > { %1241 = vmatprep.subr.bf16.mxu0 %v1513_v56 }
  0xa1   : > { %1243 = vmatpush1.bf16.msra.mxu0 %v1521_v59 }
  0xa2   : > { %1261 = vmatprep.subr.bf16.mxu0 %v1458_v38 }
 0x167   : > { %v412_v61 = vpop.f32.mrb[0].mxu0 }
 0x168   : > { %v442_v63 = vmul.f32 %v1143_v60, %v412_v61  ;;  %v1188_v0 = vpop.f32.mrb[1].mxu0  ;;  %v433_v3 = vmul.f32 %v1141_v62, %v412_v61 }
 0x16a   : > { %v444_v4 = vrot.slane %v442_v63, 4 }
 0x16b   : > { %v417_v5 = vpop.f32.mrb[2].mxu0 }
 0x16c   : > { %v446_v6 = vadd.f32 %v444_v4, %v433_v3  ;;  %v455_v8 = vmul.f32 %v1145_v1, %v417_v5  ;;  %v465_v9 = vmul.f32 %v1147_v2, %v417_v5  ;;  %v1191_v10 = vpop.f32.mrb[3].mxu0  ;;  %v1583_v1 = vrot.slane %v606_v43, %v509_v27 }
 0x16e   : > { %v456_v13 = vadd.f32 %v455_v8, %v446_v6  ;;  %v467_v14 = vrot.slane %v465_v9, 4 }
 0x16f   : > { %v422_v15 = vpop.f32.mrb[4].mxu0 }
 0x170   : > { %v469_v17 = vadd.f32 %v467_v14, %v456_v13  ;;  %v478_v18 = vmul.f32 %v1149_v11, %v422_v15  ;;  %v488_v19 = vmul.f32 %v1151_v12, %v422_v15  ;;  %v1194_v20 = vpop.f32.mrb[5].mxu0 }
 0x172   : > { %v479_v21 = vadd.f32 %v478_v18, %v469_v17  ;;  %v490_v22 = vrot.slane %v488_v19, 4 }
 0x174   : > { %v492_v23 = vadd.f32 %v490_v22, %v479_v21 }
 0x176   : > { %1152 = vmatmul.mubr.msk.f32.vlgmr.msra.gmra.mrb[0].mxu1 %vm513_vm6, %v492_v23 }
 0x177   : > { %1215 = vmatpush1.bf16.msra.mxu1 %v1466_v41  ;;  %715 = vmatprep.mubr.f32.mxu1 %v1329_v7 }
 0x178   : > { %1217 = vmatprep.subr.bf16.mxu1 %v1477_v44 }
 0x17b   : > { %1219 = vmatpush1.bf16.msra.mxu1 %v1485_v47 }
 0x17c   : > { %1221 = vmatprep.subr.bf16.mxu1 %v1495_v50 }
 0x17f   : > { %1223 = vmatpush1.bf16.msra.mxu1 %v1503_v53 }
 0x180   : > { %1225 = vmatprep.subr.bf16.mxu1 %v1513_v56 }
 0x183   : > { %1227 = vmatpush1.bf16.msra.mxu1 %v1521_v59 }
 0x184   : > { %1245 = vmatprep.subr.bf16.mxu1 %v1458_v38 }
 0x186   : > { %716 = vmatmul.mubr.f32.vlgmr.msra.gmra.mrb[2].mxu1 %v1329_v7 }
 0x187   : > { %1247 = vmatpush1.bf16.msra.mxu1 %v1466_v41  ;;  %934 = vmatprep.mubr.f32.mxu1 %v1329_v7 }
 0x188   : > { %1249 = vmatprep.subr.bf16.mxu1 %v1477_v44 }
 0x18b   : > { %1251 = vmatpush1.bf16.msra.mxu1 %v1485_v47 }
 0x18c   : > { %1253 = vmatprep.subr.bf16.mxu1 %v1495_v50 }
 0x18f   : > { %1255 = vmatpush1.bf16.msra.mxu1 %v1503_v53 }
 0x190   : > { %1257 = vmatprep.subr.bf16.mxu1 %v1513_v56 }
 0x193   : > { %1259 = vmatpush1.bf16.msra.mxu1 %v1521_v59 }
 0x249   : > { %v583_v33 = vpop.f32.mrb[0].mxu1 }
 0x24a   : > { %v584_v34 = vadd.f32 %v583_v33, %v506_v30  ;;  %v585_v35 = vpop.f32.mrb[1].mxu1 }
 0x24b   : > { %v586_v36 = vadd.f32 %v585_v35, %v510_v31 }
 0x24d   : > { %v609_v38 = vcombine.low %v584_v34, %v586_v36 }
 0x24f   : > { %v616_v16 = vrot.slane %v609_v38, %v615_v37 }
 0x251   : > { %v623_v40 = vrot.slane %v616_v16, %v615_v37  ;;  %v625_v42 = vcombine.high %v616_v16, %v616_v16 }
 0x253   : > { %v632_v45 = vrot.slane %v625_v42, %v615_v37  ;;  %v756_v46 = vcombine.high %v623_v40, %v623_v40 }
 0x255   : > { %v633_v48 = vcombine.high %v632_v45, %v632_v45  ;;  %v758_v49 = vsel %vm589_vm7, %v632_v45, %v756_v46  ;;  %v1575_v51 = vsel %vm589_vm7, %v756_v46, %v632_v45 }
 0x256   : > { %v950_v16 = vrot.slane %v1575_v51, 1 }
 0x257   : > { %v635_v54 = vsel %vm589_vm7, %v623_v40, %v633_v48  ;;  %v1580_v55 = vsel %vm589_vm7, %v633_v48, %v623_v40 }
 0x258   : > { %v731_v4 = vrot.slane %v635_v54, 1 }
 0x259   : > { %v717_v57 = vpop.f32.mrb[2].mxu1 }
 0x25a   : > { %v718_v58 = vadd.f32 %v717_v57, %v1578_v52  ;;  %v719_v60 = vpop.f32.mrb[3].mxu1 }
 0x25b   : > { %v720_v2 = vadd.f32 %v719_v60, %v1583_v1 }
 0x25c   : > { %v722_v61 = vadd.f32 %v718_v58, %v635_v54 }
 0x25e   : > { %v1153_v62 = vmul.f32 -1.442695, %v722_v61 }
 0x260   : > { %1295 = vpow2.f32 %v1153_v62 }
 0x26a   : > { %v1296_v63 = vpop.eup %1295 }
 0x26b   : > { %v726_v0 = vadd.f32 1.0, %v1296_v63 }
 0x26d   : > { %1297 = vrcp.f32 %v726_v0 }
 0x277   : > { %v1298_v3 = vpop.eup %1297 }
 0x278   : > { %v729_v5 = vmul.f32 %v1298_v3, %v720_v2  ;;  %v735_v9 = vsub.f32 1.0, %v1298_v3  ;;  %v741_v11 = vmul.f32 0.0, %v1298_v3 }
 0x27a   : > { %v733_v6 = vadd.f32 %v731_v4, %v729_v5  ;;  %v1055_v5 = vrot.slane %v1580_v55, 1 }
 0x27c   : > { %1299 = vtanh.f32 %v733_v6 }
 0x286   : > { %v1300_v8 = vpop.eup %1299 }
 0x287   : > { %737 = vrot.lane.b32.xlu1 %v1300_v8, %s1332_s11 }
 0x2f9   : > { %v738_v10 = vpop.permute.xlu1 %737 }
 0x2fa   : > { %v740_v12 = vmul.f32 %v738_v10, %v735_v9 }
 0x2fc   : > { %v742_v13 = vadd.f32 %v741_v11, %v740_v12 }
 0x2fe   : > { %v747_v14 = vrot.slane %v742_v13, %v1563_v25  ;;  %754 = vst.msk [vmem:[#allocation2] sm:$0x1] %vm753_vm8, %v742_v13 }
 0x300   : > { %748 = vrot.lane.b32.xlu0 %v747_v14, %s1332_s11 }
 0x372   : > { %v749_v15 = vpop.permute.xlu0 %748 }
 0x373   : > { %752 = vst.msk [vmem:[%s1594_s14] sm:$0x1] %vm751_vm9, %v749_v15  ;;  %1154 = vmatmul.mubr.msk.f32.vlgmr.msra.gmra.mrb[6].mxu0 %vm647_vm10, %v749_v15 }
 0x374   : > { %1263 = vmatpush1.bf16.msra.mxu0 %v1466_v41  ;;  %1039 = vmatprep.mubr.f32.mxu0 %v1329_v7 }
 0x375   : > { %1265 = vmatprep.subr.bf16.mxu0 %v1477_v44 }
 0x378   : > { %1267 = vmatpush1.bf16.msra.mxu0 %v1485_v47 }
 0x379   : > { %1269 = vmatprep.subr.bf16.mxu0 %v1495_v50  ;;  %v841_v50 = vrot.slane %v758_v49, 1 }
 0x37c   : > { %1271 = vmatpush1.bf16.msra.mxu0 %v1503_v53 }
 0x37d   : > { %1273 = vmatprep.subr.bf16.mxu0 %v1513_v56 }
 0x380   : > { %1275 = vmatpush1.bf16.msra.mxu0 %v1521_v59 }
 0x446   : > { %v827_v17 = vpop.f32.mrb[6].mxu0 }
 0x447   : > { %v828_v18 = vadd.f32 %v827_v17, %v1578_v52  ;;  %v829_v19 = vpop.f32.mrb[7].mxu0 }
 0x448   : > { %v830_v44 = vadd.f32 %v829_v19, %v1583_v1 }
 0x449   : > { %v832_v20 = vadd.f32 %v828_v18, %v758_v49 }
 0x44b   : > { %v1155_v41 = vmul.f32 -1.442695, %v832_v20 }
 0x44d   : > { %1301 = vpow2.f32 %v1155_v41 }
 0x457   : > { %v1302_v7 = vpop.eup %1301 }
 0x458   : > { %v836_v21 = vadd.f32 1.0, %v1302_v7 }
 0x45a   : > { %1303 = vrcp.f32 %v836_v21 }
 0x464   : > { %v1304_v47 = vpop.eup %1303 }
 0x465   : > { %v839_v22 = vmul.f32 %v1304_v47, %v830_v44  ;;  %v845_v59 = vsub.f32 1.0, %v1304_v47  ;;  %v851_v24 = vmul.f32 %v1304_v47, %v742_v13 }
 0x467   : > { %v843_v53 = vadd.f32 %v841_v50, %v839_v22 }
 0x469   : > { %1305 = vtanh.f32 %v843_v53 }
 0x473   : > { %v1306_v56 = vpop.eup %1305 }
 0x474   : > { %847 = vrot.lane.b32.xlu1 %v1306_v56, %s1332_s11 }
 0x4e6   : > { %v848_v23 = vpop.permute.xlu1 %847 }
 0x4e7   : > { %v850_v26 = vmul.f32 %v848_v23, %v845_v59 }
 0x4e9   : > { %v852_v27 = vadd.f32 %v851_v24, %v850_v26 }
 0x4eb   : > { %v857_v28 = vrot.slane %v852_v27, %v1563_v25 }
 0x4ed   : > { %866 = vrot.lane.b32.xlu0 %v857_v28, %s1332_s11 }
 0x55f   : > { %v867_v29 = vpop.permute.xlu0 %866 }
 0x560   : > { %1156 = vmatmul.mubr.msk.f32.vlgmr.msra.gmra.mrb[4].mxu1 %vm647_vm10, %v867_v29 }
 0x633   : > { %v936_v30 = vpop.f32.mrb[4].mxu1 }
 0x634   : > { %v937_v31 = vadd.f32 %v936_v30, %v1578_v52  ;;  %v938_v32 = vpop.f32.mrb[5].mxu1 }
 0x635   : > { %v939_v37 = vadd.f32 %v938_v32, %v1583_v1 }
 0x636   : > { %v941_v33 = vadd.f32 %v937_v31, %v1575_v51 }
 0x638   : > { %v1157_v34 = vmul.f32 -1.442695, %v941_v33 }
 0x63a   : > { %1307 = vpow2.f32 %v1157_v34 }
 0x644   : > { %v1308_v35 = vpop.eup %1307 }
 0x645   : > { %v945_v36 = vadd.f32 1.0, %v1308_v35 }
 0x647   : > { %1309 = vrcp.f32 %v945_v36 }
 0x651   : > { %v1310_v38 = vpop.eup %1309 }
 0x652   : > { %v948_v39 = vmul.f32 %v1310_v38, %v939_v37  ;;  %v954_v43 = vsub.f32 1.0, %v1310_v38  ;;  %v960_v46 = vmul.f32 %v1310_v38, %v852_v27 }
 0x654   : > { %v952_v40 = vadd.f32 %v950_v16, %v948_v39 }
 0x656   : > { %1311 = vtanh.f32 %v952_v40 }
 0x660   : > { %v1312_v42 = vpop.eup %1311 }
 0x661   : > { %956 = vrot.lane.b32.xlu1 %v1312_v42, %s1332_s11 }
 0x6d3   : > { %v957_v45 = vpop.permute.xlu1 %956 }
 0x6d4   : > { %v959_v48 = vmul.f32 %v957_v45, %v954_v43 }
 0x6d6   : > { %v961_v49 = vadd.f32 %v960_v46, %v959_v48 }
 0x6d8   : > { %v967_v54 = vrot.slane %v961_v49, %v1563_v25 }
 0x6da   : > { %968 = vrot.lane.b32.xlu0 %v967_v54, %s1332_s11 }
 0x6de   : > { %858 = vrot.lane.b32.xlu0 %v857_v28, %s1333_s28 }
 0x74c   : > { %v969_v51 = vpop.permute.xlu0 %968 }
 0x74d   : > { %1158 = vmatmul.mubr.msk.f32.vlgmr.msra.gmra.mrb[8].mxu0 %vm647_vm10, %v969_v51 }
 0x750   : > { %v859_v57 = vpop.permute.xlu0 %858 }
 0x751   : > { %862 = vst.msk [vmem:[%s1594_s14] sm:$0x1] %vm861_vm11, %v859_v57 }
 0x752   : > { %864 = vst.msk [vmem:[#allocation2] sm:$0x1] %vm863_vm12, %v859_v57  ;;  %962 = vst.msk [vmem:[%s1594_s14] sm:$0x1] %vm863_vm12, %v961_v49 }
 0x753   : > { %971 = vst.msk [vmem:[#allocation2] sm:$0x1] %vm861_vm11, %v969_v51 }
 0x820   : > { %v1041_v58 = vpop.f32.mrb[8].mxu0 }
 0x821   : > { %v1042_v60 = vadd.f32 %v1041_v58, %v1578_v52  ;;  %v1043_v61 = vpop.f32.mrb[9].mxu0 }
 0x822   : > { %v1044_v3 = vadd.f32 %v1043_v61, %v1583_v1 }
 0x823   : > { %v1046_v62 = vadd.f32 %v1042_v60, %v1580_v55 }
 0x825   : > { %v1159_v63 = vmul.f32 -1.442695, %v1046_v62 }
 0x827   : > { %1313 = vpow2.f32 %v1159_v63 }
 0x831   : > { %v1314_v0 = vpop.eup %1313 }
 0x832   : > { %v1050_v2 = vadd.f32 1.0, %v1314_v0 }
 0x834   : > { %1315 = vrcp.f32 %v1050_v2 }
 0x83e   : > { %v1316_v4 = vpop.eup %1315 }
 0x83f   : > { %v1053_v6 = vmul.f32 %v1316_v4, %v1044_v3  ;;  %v1059_v52 = vsub.f32 1.0, %v1316_v4  ;;  %v1065_v11 = vmul.f32 %v1316_v4, %v961_v49 }
 0x841   : > { %v1057_v8 = vadd.f32 %v1055_v5, %v1053_v6 }
 0x843   : > { %1317 = vtanh.f32 %v1057_v8 }
 0x84d   : > { %v1318_v9 = vpop.eup %1317 }
 0x84e   : > { %1061 = vrot.lane.b32.xlu1 %v1318_v9, %s1332_s11 }
 0x8c0   : > { %v1062_v10 = vpop.permute.xlu1 %1061 }
 0x8c1   : > { %v1064_v12 = vmul.f32 %v1062_v10, %v1059_v52 }
 0x8c3   : > { %v1066_v13 = vadd.f32 %v1065_v11, %v1064_v12 }
 0x8c5   : > { %v1071_v14 = vrot.slane %v1066_v13, %v1563_v25 }
 0x8c7   : > { %1072 = vrot.lane.b32.xlu1 %v1071_v14, %s1334_s15 }
 0x939   : > { %v1073_v1 = vpop.permute.xlu1 %1072 }
 0x93a   : > { %1075 = vst.msk [vmem:[%s1594_s14] sm:$0x1] %vm753_vm8, %v1073_v1 }
 0x93b   : > { %1076 = vst.msk [vmem:[#allocation2] sm:$0x1] %vm751_vm9, %v1073_v1 }
 0x941   : > { %v1077_v55 = vld [vmem:[%s1594_s14] sm:$0x1] }
 0x942   : > { %v1078_v15 = vld [vmem:[#allocation2] sm:$0x1] }
 0x943   : > { %v1079_v17 = vadd.f32 %v1078_v15, %v1077_v55 }
 0x945   : > { %1080 = vst [vmem:[%s1594_s14] sm:$0x1] %v1079_v17 }
 0x946 PF: > { %s18_s27 = sadd.s32 1, %s1325_s27  }
 0x947   : > { %p15_p4 = scmp.ge.s32.totalorder %s18_s27, 4  }
 0x949   :  { %17 = sbr.rel (!%p15_p4) target bundleno = 1 (0x1), region = 87 }

</bundles_post_ra>
